<compile_context>
chip_gen: v7x
topology: tpu7x:2x2x1
jax: 0.10.0
libtpu: 0.0.40
codegen_flags: <defaults>
</compile_context>

<pallas_src>
import functools

import jax
import jax.numpy as jnp
from jax.experimental import pallas as pl
from jax.experimental.pallas import tpu as pltpu


def _cdiv(a, b):
    return -(-a // b)


def _patch_merging_kernel(x_ref, we_ref, wo_ref, bias_ref, o_ref, *,
                          eps, w2, c2, c4, wc):
    # x_ref:    (tr, 2*W*C)  f32/bf16 row-group tile:
    #           lanes [0:W*C)      = image row 2i   (tokens' [x0|x2] halves)
    #           lanes [W*C:2*W*C)  = image row 2i+1 (tokens' [x1|x3] halves)
    # we_ref:   (2C, 4C) bf16  fused weight rows for the [x0|x2] channels (in, out)
    # wo_ref:   (2C, 4C) bf16  fused weight rows for the [x1|x3] channels (in, out)
    # bias_ref: (1, 4C)  f32   = W @ beta
    # o_ref:    (tr, W2*4C)    token-major along lanes within each row-group
    inv_c4 = 1.0 / c4
    # Static unrolled loop over the W/2 merged tokens of each row-group
    # (W2 <= ~28 for Swin resolutions, so unrolled code size stays small).
    for j in range(w2):
        a = x_ref[:, j * c2:(j + 1) * c2].astype(jnp.float32)            # [x0|x2]
        b = x_ref[:, wc + j * c2: wc + (j + 1) * c2].astype(jnp.float32)  # [x1|x3]

        # Two-pass LayerNorm stats over the union of both halves (= 4C chans),
        # all in f32 (better cancellation behavior than E[x^2]-mean^2).
        mean = (jnp.sum(a, axis=-1, keepdims=True)
                + jnp.sum(b, axis=-1, keepdims=True)) * inv_c4
        da = a - mean
        db = b - mean
        var = (jnp.sum(da * da, axis=-1, keepdims=True)
               + jnp.sum(db * db, axis=-1, keepdims=True)) * inv_c4
        inv = jax.lax.rsqrt(var + eps)

        # gamma is folded into the weight, beta into the bias -> plain scale.
        za = (da * inv).astype(jnp.bfloat16)
        zb = (db * inv).astype(jnp.bfloat16)

        # Linear(4C -> 4C): two 2-D bf16 MXU matmuls with f32 accumulation,
        # canonical ((1,),(0,)) contraction against the (in, out) weights.
        acc = jnp.dot(za, we_ref[...], preferred_element_type=jnp.float32)
        acc = acc + jnp.dot(zb, wo_ref[...], preferred_element_type=jnp.float32)
        acc = acc + bias_ref[...]

        o_ref[:, j * c4:(j + 1) * c4] = acc.astype(o_ref.dtype)


def patch_merging_pallas(x, w, gamma, beta, input_resolution, *, eps=1e-5,
                         out_dtype=jnp.bfloat16, tr=None):
    """x: (B, H*W, C). w: (4C, 4C) PyTorch Linear weight (out, in).
    gamma/beta: (4C,) LayerNorm affine. Returns (B, (H/2)*(W/2), 4C).
    out_dtype=jnp.bfloat16 halves the write traffic; pass jnp.float32 (or None
    for x.dtype) to match the PyTorch module's dtype exactly."""
    H, W = input_resolution
    B, L, C = x.shape
    assert L == H * W, "input feature has wrong size"
    assert H % 2 == 0 and W % 2 == 0, f"x size ({H}*{W}) are not even."
    C2, C4 = 2 * C, 4 * C
    assert C4 % 128 == 0, "4*dim must be lane-aligned (multiple of 128)"
    W2 = W // 2
    R = B * (H // 2)                 # number of merged-token row-groups
    row_len = 2 * W * C              # elements per row-group (== W2 * 4C)
    out_dtype = x.dtype if out_dtype is None else out_dtype

    # ---- free view: fuse the 2x2 space-to-depth gather into the kernel ----
    x2d = x.reshape(R, row_len)      # metadata-only reshape, no HBM traffic

    # ---- fold LayerNorm affine into the weight; permute to [x0|x2]/[x1|x3],
    #      transpose once to (in, out), cast to bf16 for the MXU ----
    w32 = w.astype(jnp.float32)
    wt = (w32 * gamma.astype(jnp.float32)[None, :]).T           # (4C in, 4C out)
    we_t = jnp.concatenate([wt[0:C], wt[2 * C:3 * C]], axis=0).astype(jnp.bfloat16)
    wo_t = jnp.concatenate([wt[C:2 * C], wt[3 * C:4 * C]], axis=0).astype(jnp.bfloat16)
    bias = (w32 @ beta.astype(jnp.float32)).reshape(1, C4)

    # ---- VMEM budget + row-group tile selection -------------------------------
    itemsize_in = x.dtype.itemsize
    itemsize_out = jnp.dtype(out_dtype).itemsize
    try:
        vmem_cap = int(pltpu.get_tpu_info().vmem_capacity_bytes)
    except Exception:
        vmem_cap = 64 * 1024 * 1024          # conservative (v7x per-core VMEM)
    cap = (vmem_cap * 85) // 100             # headroom for Mosaic internal scratch

    weight_bytes = 2 * C2 * C4 * 2 + C4 * 4  # two bf16 halves + f32 bias (resident)
    per_rg = row_len * (itemsize_in + itemsize_out)

    if tr is None:
        # double-buffered in+out tiles target ~half of the budget left after
        # the (possibly double-buffered) resident weights.
        avail = max(4 * per_rg * 8, cap - 2 * weight_bytes)
        tr = int(avail // (4 * per_rg))
        tr = max(8, min(tr, 1024))
    if tr >= R:
        tr = R                               # full extent (legal even if R < 8)
    else:
        tr = max(8, (tr // 8) * 8)           # respect 8-sublane tiling
        if _cdiv(R, tr) % 2:                 # v7x megacore: prefer even step count
            for cand in range(tr, max(8, tr // 2) - 1, -8):
                if _cdiv(R, cand) % 2 == 0:
                    tr = cand
                    break
    grid_r = _cdiv(R, tr)                    # partial last block handled by masking

    vmem_need = (2 * weight_bytes
                 + 2 * tr * row_len * itemsize_in
                 + 2 * tr * row_len * itemsize_out
                 + (2 << 20))
    vmem_limit = min(cap, max(32 << 20, (vmem_need * 5) // 4))
    # NOTE: the weight/bias specs use a constant index_map so the pipeline may
    # still allocate two buffers for them; the budget above accounts for that.

    out = pl.pallas_call(
        functools.partial(_patch_merging_kernel, eps=eps, w2=W2, c2=C2, c4=C4,
                          wc=W * C),
        out_shape=jax.ShapeDtypeStruct((R, row_len), out_dtype),
        grid_spec=pltpu.PrefetchScalarGridSpec(
            num_scalar_prefetch=0,
            grid=(grid_r,),
            in_specs=[
                pl.BlockSpec((tr, row_len), lambda i: (i, 0)),   # row-group tile
                pl.BlockSpec((C2, C4), lambda i: (0, 0)),        # W_even (resident)
                pl.BlockSpec((C2, C4), lambda i: (0, 0)),        # W_odd  (resident)
                pl.BlockSpec((1, C4), lambda i: (0, 0)),         # bias   (resident)
            ],
            out_specs=pl.BlockSpec((tr, row_len), lambda i: (i, 0)),
        ),
        compiler_params=pltpu.CompilerParams(
            dimension_semantics=("parallel",),
            vmem_limit_bytes=int(vmem_limit),
        ),
    )(x2d, we_t, wo_t, bias)

    # (R, W2*4C) -> (B, (H/2)*(W/2), 4C): contiguous, free reshape.
    return out.reshape(B, (H // 2) * W2, C4)


def patch_merging_ref(x, w, gamma, beta, input_resolution, *, eps=1e-5):
    """Pure-JAX f32 reference mirroring the PyTorch module."""
    H, W = input_resolution
    B, L, C = x.shape
    xg = x.reshape(B, H, W, C)
    x0 = xg[:, 0::2, 0::2, :]
    x1 = xg[:, 1::2, 0::2, :]
    x2 = xg[:, 0::2, 1::2, :]
    x3 = xg[:, 1::2, 1::2, :]
    xm = jnp.concatenate([x0, x1, x2, x3], axis=-1).reshape(B, -1, 4 * C)
    mean = jnp.mean(xm, axis=-1, keepdims=True)
    var = jnp.mean((xm - mean) ** 2, axis=-1, keepdims=True)
    y = (xm - mean) * jax.lax.rsqrt(var + eps) * gamma + beta
    return jnp.einsum("blc,oc->blo", y, w)


if __name__ == "__main__":
    # Small shapes consistent with the module: dim=64 -> 4*dim=256 (lane-aligned),
    # input_resolution=(8, 8), batch=2.
    B = 2
    H = W = 8
    dim = 64
    C4 = 4 * dim

    key = jax.random.PRNGKey(0)
    kx, kw, kg, kb = jax.random.split(key, 4)

    x = jax.random.normal(kx, (B, H * W, dim), dtype=jnp.float32)
    w = jax.random.normal(kw, (C4, C4), dtype=jnp.float32) * 0.02   # (out, in)
    gamma = 1.0 + 0.1 * jax.random.normal(kg, (C4,), dtype=jnp.float32)
    beta = 0.05 * jax.random.normal(kb, (C4,), dtype=jnp.float32)

    fwd = jax.jit(functools.partial(patch_merging_pallas, input_resolution=(H, W)))
    out = jax.block_until_ready(fwd(x, w, gamma, beta))

    ref = patch_merging_ref(x, w, gamma, beta, (H, W))
    assert out.shape == (B, (H // 2) * (W // 2), C4)
    out_f32 = out.astype(jnp.float32)
    # bf16 MXU inputs + bf16 output -> relaxed tolerance (LN stats / accumulation
    # stay f32).
    assert jnp.allclose(out_f32, ref, atol=2e-2, rtol=2e-2), (
        f"mismatch vs reference (max abs err {jnp.max(jnp.abs(out_f32 - ref))})")

    print("KERNEL_OK")
</pallas_src>

<mosaic_0001>
module attributes {stable_mosaic.version = 11 : i64} {
  func.func @_patch_merging_kernel(%arg0: i32, %arg1: memref<8x1024xf32, #tpu.memory_space<vmem>>, %arg2: memref<128x256xbf16, #tpu.memory_space<vmem>>, %arg3: memref<128x256xbf16, #tpu.memory_space<vmem>>, %arg4: memref<1x256xf32, #tpu.memory_space<vmem>>, %arg5: memref<8x1024xbf16, #tpu.memory_space<vmem>>) attributes {dimension_semantics = [#tpu.dimension_semantics<parallel>], iteration_bounds = array<i64: 1>, scalar_prefetch = 0 : i64, scratch_operands = 0 : i64, tpu.core_type = #tpu.core_type<tc>, window_params = [{transform_indices = @transform_0, window_bounds = array<i64: 8, 1024>}, {pipeline_mode = #tpu.pipeline_mode<synchronous>, transform_indices = @transform_1, window_bounds = array<i64: 128, 256>}, {pipeline_mode = #tpu.pipeline_mode<synchronous>, transform_indices = @transform_2, window_bounds = array<i64: 128, 256>}, {pipeline_mode = #tpu.pipeline_mode<synchronous>, transform_indices = @transform_3, window_bounds = array<i64: 1, 256>}, {transform_indices = @transform_4, window_bounds = array<i64: 8, 1024>}]} {
    %c0 = arith.constant 0 : index
    %c0_0 = arith.constant 0 : index
    %0 = vector.load %arg1[%c0, %c0_0] : memref<8x1024xf32, #tpu.memory_space<vmem>>, vector<8x128xf32>
    %c0_1 = arith.constant 0 : index
    %c512 = arith.constant 512 : index
    %1 = vector.load %arg1[%c0_1, %c512] : memref<8x1024xf32, #tpu.memory_space<vmem>>, vector<8x128xf32>
    %cst = arith.constant dense<0.000000e+00> : vector<8xf32>
    %2 = vector.multi_reduction <add>, %0, %cst [1] : vector<8x128xf32> to vector<8xf32>
    %3 = vector.shape_cast %2 : vector<8xf32> to vector<8x1xf32>
    %cst_2 = arith.constant dense<0.000000e+00> : vector<8xf32>
    %4 = vector.multi_reduction <add>, %1, %cst_2 [1] : vector<8x128xf32> to vector<8xf32>
    %5 = vector.shape_cast %4 : vector<8xf32> to vector<8x1xf32>
    %6 = arith.addf %3, %5 : vector<8x1xf32>
    %cst_3 = arith.constant 3.906250e-03 : f32
    %7 = vector.broadcast %cst_3 : f32 to vector<8x1xf32>
    %8 = arith.mulf %6, %7 : vector<8x1xf32>
    %9 = vector.broadcast %8 : vector<8x1xf32> to vector<8x128xf32>
    %10 = arith.subf %0, %9 : vector<8x128xf32>
    %11 = vector.broadcast %8 : vector<8x1xf32> to vector<8x128xf32>
    %12 = arith.subf %1, %11 : vector<8x128xf32>
    %13 = arith.mulf %10, %10 : vector<8x128xf32>
    %cst_4 = arith.constant dense<0.000000e+00> : vector<8xf32>
    %14 = vector.multi_reduction <add>, %13, %cst_4 [1] : vector<8x128xf32> to vector<8xf32>
    %15 = vector.shape_cast %14 : vector<8xf32> to vector<8x1xf32>
    %16 = arith.mulf %12, %12 : vector<8x128xf32>
    %cst_5 = arith.constant dense<0.000000e+00> : vector<8xf32>
    %17 = vector.multi_reduction <add>, %16, %cst_5 [1] : vector<8x128xf32> to vector<8xf32>
    %18 = vector.shape_cast %17 : vector<8xf32> to vector<8x1xf32>
    %19 = arith.addf %15, %18 : vector<8x1xf32>
    %cst_6 = arith.constant 3.906250e-03 : f32
    %20 = vector.broadcast %cst_6 : f32 to vector<8x1xf32>
    %21 = arith.mulf %19, %20 : vector<8x1xf32>
    %cst_7 = arith.constant 9.99999974E-6 : f32
    %22 = vector.broadcast %cst_7 : f32 to vector<8x1xf32>
    %23 = arith.addf %21, %22 : vector<8x1xf32>
    %24 = math.rsqrt %23 : vector<8x1xf32>
    %25 = vector.broadcast %24 : vector<8x1xf32> to vector<8x128xf32>
    %26 = arith.mulf %10, %25 : vector<8x128xf32>
    %27 = arith.truncf %26 : vector<8x128xf32> to vector<8x128xbf16>
    %28 = vector.broadcast %24 : vector<8x1xf32> to vector<8x128xf32>
    %29 = arith.mulf %12, %28 : vector<8x128xf32>
    %30 = arith.truncf %29 : vector<8x128xf32> to vector<8x128xbf16>
    %c0_8 = arith.constant 0 : index
    %c0_9 = arith.constant 0 : index
    %31 = vector.load %arg2[%c0_8, %c0_9] : memref<128x256xbf16, #tpu.memory_space<vmem>>, vector<128x256xbf16>
    %cst_10 = arith.constant dense<0.000000e+00> : vector<8x256xf32>
    %32 = tpu.matmul %27, %31, %cst_10 {dimension_numbers = #tpu.dot_dimension_numbers<[1], [0], [0], [1], [0, 0, 1, 1], [], []>} : vector<8x128xbf16>, vector<128x256xbf16>, vector<8x256xf32> -> vector<8x256xf32>
    %c0_11 = arith.constant 0 : index
    %c0_12 = arith.constant 0 : index
    %33 = vector.load %arg3[%c0_11, %c0_12] : memref<128x256xbf16, #tpu.memory_space<vmem>>, vector<128x256xbf16>
    %cst_13 = arith.constant dense<0.000000e+00> : vector<8x256xf32>
    %34 = tpu.matmul %30, %33, %cst_13 {dimension_numbers = #tpu.dot_dimension_numbers<[1], [0], [0], [1], [0, 0, 1, 1], [], []>} : vector<8x128xbf16>, vector<128x256xbf16>, vector<8x256xf32> -> vector<8x256xf32>
    %35 = arith.addf %32, %34 : vector<8x256xf32>
    %c0_14 = arith.constant 0 : index
    %c0_15 = arith.constant 0 : index
    %36 = vector.load %arg4[%c0_14, %c0_15] : memref<1x256xf32, #tpu.memory_space<vmem>>, vector<1x256xf32>
    %37 = vector.broadcast %36 : vector<1x256xf32> to vector<8x256xf32>
    %38 = arith.addf %35, %37 : vector<8x256xf32>
    %39 = arith.truncf %38 : vector<8x256xf32> to vector<8x256xbf16>
    %c0_16 = arith.constant 0 : index
    %c0_17 = arith.constant 0 : index
    %40 = vector.load %arg5[%c0_16, %c0_17] : memref<8x1024xbf16, #tpu.memory_space<vmem>>, vector<8x256xbf16>
    tpu.vector_store %arg5[%c0_16, %c0_17], %39 {strides = array<i32>} : memref<8x1024xbf16, #tpu.memory_space<vmem>>, vector<8x256xbf16>,
    %c0_18 = arith.constant 0 : index
    %c128 = arith.constant 128 : index
    %41 = vector.load %arg1[%c0_18, %c128] : memref<8x1024xf32, #tpu.memory_space<vmem>>, vector<8x128xf32>
    %c0_19 = arith.constant 0 : index
    %c640 = arith.constant 640 : index
    %42 = vector.load %arg1[%c0_19, %c640] : memref<8x1024xf32, #tpu.memory_space<vmem>>, vector<8x128xf32>
    %cst_20 = arith.constant dense<0.000000e+00> : vector<8xf32>
    %43 = vector.multi_reduction <add>, %41, %cst_20 [1] : vector<8x128xf32> to vector<8xf32>
    %44 = vector.shape_cast %43 : vector<8xf32> to vector<8x1xf32>
    %cst_21 = arith.constant dense<0.000000e+00> : vector<8xf32>
    %45 = vector.multi_reduction <add>, %42, %cst_21 [1] : vector<8x128xf32> to vector<8xf32>
    %46 = vector.shape_cast %45 : vector<8xf32> to vector<8x1xf32>
    %47 = arith.addf %44, %46 : vector<8x1xf32>
    %cst_22 = arith.constant 3.906250e-03 : f32
    %48 = vector.broadcast %cst_22 : f32 to vector<8x1xf32>
    %49 = arith.mulf %47, %48 : vector<8x1xf32>
    %50 = vector.broadcast %49 : vector<8x1xf32> to vector<8x128xf32>
    %51 = arith.subf %41, %50 : vector<8x128xf32>
    %52 = vector.broadcast %49 : vector<8x1xf32> to vector<8x128xf32>
    %53 = arith.subf %42, %52 : vector<8x128xf32>
    %54 = arith.mulf %51, %51 : vector<8x128xf32>
    %cst_23 = arith.constant dense<0.000000e+00> : vector<8xf32>
    %55 = vector.multi_reduction <add>, %54, %cst_23 [1] : vector<8x128xf32> to vector<8xf32>
    %56 = vector.shape_cast %55 : vector<8xf32> to vector<8x1xf32>
    %57 = arith.mulf %53, %53 : vector<8x128xf32>
    %cst_24 = arith.constant dense<0.000000e+00> : vector<8xf32>
    %58 = vector.multi_reduction <add>, %57, %cst_24 [1] : vector<8x128xf32> to vector<8xf32>
    %59 = vector.shape_cast %58 : vector<8xf32> to vector<8x1xf32>
    %60 = arith.addf %56, %59 : vector<8x1xf32>
    %cst_25 = arith.constant 3.906250e-03 : f32
    %61 = vector.broadcast %cst_25 : f32 to vector<8x1xf32>
    %62 = arith.mulf %60, %61 : vector<8x1xf32>
    %cst_26 = arith.constant 9.99999974E-6 : f32
    %63 = vector.broadcast %cst_26 : f32 to vector<8x1xf32>
    %64 = arith.addf %62, %63 : vector<8x1xf32>
    %65 = math.rsqrt %64 : vector<8x1xf32>
    %66 = vector.broadcast %65 : vector<8x1xf32> to vector<8x128xf32>
    %67 = arith.mulf %51, %66 : vector<8x128xf32>
    %68 = arith.truncf %67 : vector<8x128xf32> to vector<8x128xbf16>
    %69 = vector.broadcast %65 : vector<8x1xf32> to vector<8x128xf32>
    %70 = arith.mulf %53, %69 : vector<8x128xf32>
    %71 = arith.truncf %70 : vector<8x128xf32> to vector<8x128xbf16>
    %c0_27 = arith.constant 0 : index
    %c0_28 = arith.constant 0 : index
    %72 = vector.load %arg2[%c0_27, %c0_28] : memref<128x256xbf16, #tpu.memory_space<vmem>>, vector<128x256xbf16>
    %cst_29 = arith.constant dense<0.000000e+00> : vector<8x256xf32>
    %73 = tpu.matmul %68, %72, %cst_29 {dimension_numbers = #tpu.dot_dimension_numbers<[1], [0], [0], [1], [0, 0, 1, 1], [], []>} : vector<8x128xbf16>, vector<128x256xbf16>, vector<8x256xf32> -> vector<8x256xf32>
    %c0_30 = arith.constant 0 : index
    %c0_31 = arith.constant 0 : index
    %74 = vector.load %arg3[%c0_30, %c0_31] : memref<128x256xbf16, #tpu.memory_space<vmem>>, vector<128x256xbf16>
    %cst_32 = arith.constant dense<0.000000e+00> : vector<8x256xf32>
    %75 = tpu.matmul %71, %74, %cst_32 {dimension_numbers = #tpu.dot_dimension_numbers<[1], [0], [0], [1], [0, 0, 1, 1], [], []>} : vector<8x128xbf16>, vector<128x256xbf16>, vector<8x256xf32> -> vector<8x256xf32>
    %76 = arith.addf %73, %75 : vector<8x256xf32>
    %c0_33 = arith.constant 0 : index
    %c0_34 = arith.constant 0 : index
    %77 = vector.load %arg4[%c0_33, %c0_34] : memref<1x256xf32, #tpu.memory_space<vmem>>, vector<1x256xf32>
    %78 = vector.broadcast %77 : vector<1x256xf32> to vector<8x256xf32>
    %79 = arith.addf %76, %78 : vector<8x256xf32>
    %80 = arith.truncf %79 : vector<8x256xf32> to vector<8x256xbf16>
    %c0_35 = arith.constant 0 : index
    %c256 = arith.constant 256 : index
    %81 = vector.load %arg5[%c0_35, %c256] : memref<8x1024xbf16, #tpu.memory_space<vmem>>, vector<8x256xbf16>
    tpu.vector_store %arg5[%c0_35, %c256], %80 {strides = array<i32>} : memref<8x1024xbf16, #tpu.memory_space<vmem>>, vector<8x256xbf16>,
    %c0_36 = arith.constant 0 : index
    %c256_37 = arith.constant 256 : index
    %82 = vector.load %arg1[%c0_36, %c256_37] : memref<8x1024xf32, #tpu.memory_space<vmem>>, vector<8x128xf32>
    %c0_38 = arith.constant 0 : index
    %c768 = arith.constant 768 : index
    %83 = vector.load %arg1[%c0_38, %c768] : memref<8x1024xf32, #tpu.memory_space<vmem>>, vector<8x128xf32>
    %cst_39 = arith.constant dense<0.000000e+00> : vector<8xf32>
    %84 = vector.multi_reduction <add>, %82, %cst_39 [1] : vector<8x128xf32> to vector<8xf32>
    %85 = vector.shape_cast %84 : vector<8xf32> to vector<8x1xf32>
    %cst_40 = arith.constant dense<0.000000e+00> : vector<8xf32>
    %86 = vector.multi_reduction <add>, %83, %cst_40 [1] : vector<8x128xf32> to vector<8xf32>
    %87 = vector.shape_cast %86 : vector<8xf32> to vector<8x1xf32>
    %88 = arith.addf %85, %87 : vector<8x1xf32>
    %cst_41 = arith.constant 3.906250e-03 : f32
    %89 = vector.broadcast %cst_41 : f32 to vector<8x1xf32>
    %90 = arith.mulf %88, %89 : vector<8x1xf32>
    %91 = vector.broadcast %90 : vector<8x1xf32> to vector<8x128xf32>
    %92 = arith.subf %82, %91 : vector<8x128xf32>
    %93 = vector.broadcast %90 : vector<8x1xf32> to vector<8x128xf32>
    %94 = arith.subf %83, %93 : vector<8x128xf32>
    %95 = arith.mulf %92, %92 : vector<8x128xf32>
    %cst_42 = arith.constant dense<0.000000e+00> : vector<8xf32>
    %96 = vector.multi_reduction <add>, %95, %cst_42 [1] : vector<8x128xf32> to vector<8xf32>
    %97 = vector.shape_cast %96 : vector<8xf32> to vector<8x1xf32>
    %98 = arith.mulf %94, %94 : vector<8x128xf32>
    %cst_43 = arith.constant dense<0.000000e+00> : vector<8xf32>
    %99 = vector.multi_reduction <add>, %98, %cst_43 [1] : vector<8x128xf32> to vector<8xf32>
    %100 = vector.shape_cast %99 : vector<8xf32> to vector<8x1xf32>
    %101 = arith.addf %97, %100 : vector<8x1xf32>
    %cst_44 = arith.constant 3.906250e-03 : f32
    %102 = vector.broadcast %cst_44 : f32 to vector<8x1xf32>
    %103 = arith.mulf %101, %102 : vector<8x1xf32>
    %cst_45 = arith.constant 9.99999974E-6 : f32
    %104 = vector.broadcast %cst_45 : f32 to vector<8x1xf32>
    %105 = arith.addf %103, %104 : vector<8x1xf32>
    %106 = math.rsqrt %105 : vector<8x1xf32>
    %107 = vector.broadcast %106 : vector<8x1xf32> to vector<8x128xf32>
    %108 = arith.mulf %92, %107 : vector<8x128xf32>
    %109 = arith.truncf %108 : vector<8x128xf32> to vector<8x128xbf16>
    %110 = vector.broadcast %106 : vector<8x1xf32> to vector<8x128xf32>
    %111 = arith.mulf %94, %110 : vector<8x128xf32>
    %112 = arith.truncf %111 : vector<8x128xf32> to vector<8x128xbf16>
    %c0_46 = arith.constant 0 : index
    %c0_47 = arith.constant 0 : index
    %113 = vector.load %arg2[%c0_46, %c0_47] : memref<128x256xbf16, #tpu.memory_space<vmem>>, vector<128x256xbf16>
    %cst_48 = arith.constant dense<0.000000e+00> : vector<8x256xf32>
    %114 = tpu.matmul %109, %113, %cst_48 {dimension_numbers = #tpu.dot_dimension_numbers<[1], [0], [0], [1], [0, 0, 1, 1], [], []>} : vector<8x128xbf16>, vector<128x256xbf16>, vector<8x256xf32> -> vector<8x256xf32>
    %c0_49 = arith.constant 0 : index
    %c0_50 = arith.constant 0 : index
    %115 = vector.load %arg3[%c0_49, %c0_50] : memref<128x256xbf16, #tpu.memory_space<vmem>>, vector<128x256xbf16>
    %cst_51 = arith.constant dense<0.000000e+00> : vector<8x256xf32>
    %116 = tpu.matmul %112, %115, %cst_51 {dimension_numbers = #tpu.dot_dimension_numbers<[1], [0], [0], [1], [0, 0, 1, 1], [], []>} : vector<8x128xbf16>, vector<128x256xbf16>, vector<8x256xf32> -> vector<8x256xf32>
    %117 = arith.addf %114, %116 : vector<8x256xf32>
    %c0_52 = arith.constant 0 : index
    %c0_53 = arith.constant 0 : index
    %118 = vector.load %arg4[%c0_52, %c0_53] : memref<1x256xf32, #tpu.memory_space<vmem>>, vector<1x256xf32>
    %119 = vector.broadcast %118 : vector<1x256xf32> to vector<8x256xf32>
    %120 = arith.addf %117, %119 : vector<8x256xf32>
    %121 = arith.truncf %120 : vector<8x256xf32> to vector<8x256xbf16>
    %c0_54 = arith.constant 0 : index
    %c512_55 = arith.constant 512 : index
    %122 = vector.load %arg5[%c0_54, %c512_55] : memref<8x1024xbf16, #tpu.memory_space<vmem>>, vector<8x256xbf16>
    tpu.vector_store %arg5[%c0_54, %c512_55], %121 {strides = array<i32>} : memref<8x1024xbf16, #tpu.memory_space<vmem>>, vector<8x256xbf16>,
    %c0_56 = arith.constant 0 : index
    %c384 = arith.constant 384 : index
    %123 = vector.load %arg1[%c0_56, %c384] : memref<8x1024xf32, #tpu.memory_space<vmem>>, vector<8x128xf32>
    %c0_57 = arith.constant 0 : index
    %c896 = arith.constant 896 : index
    %124 = vector.load %arg1[%c0_57, %c896] : memref<8x1024xf32, #tpu.memory_space<vmem>>, vector<8x128xf32>
    %cst_58 = arith.constant dense<0.000000e+00> : vector<8xf32>
    %125 = vector.multi_reduction <add>, %123, %cst_58 [1] : vector<8x128xf32> to vector<8xf32>
    %126 = vector.shape_cast %125 : vector<8xf32> to vector<8x1xf32>
    %cst_59 = arith.constant dense<0.000000e+00> : vector<8xf32>
    %127 = vector.multi_reduction <add>, %124, %cst_59 [1] : vector<8x128xf32> to vector<8xf32>
    %128 = vector.shape_cast %127 : vector<8xf32> to vector<8x1xf32>
    %129 = arith.addf %126, %128 : vector<8x1xf32>
    %cst_60 = arith.constant 3.906250e-03 : f32
    %130 = vector.broadcast %cst_60 : f32 to vector<8x1xf32>
    %131 = arith.mulf %129, %130 : vector<8x1xf32>
    %132 = vector.broadcast %131 : vector<8x1xf32> to vector<8x128xf32>
    %133 = arith.subf %123, %132 : vector<8x128xf32>
    %134 = vector.broadcast %131 : vector<8x1xf32> to vector<8x128xf32>
    %135 = arith.subf %124, %134 : vector<8x128xf32>
    %136 = arith.mulf %133, %133 : vector<8x128xf32>
    %cst_61 = arith.constant dense<0.000000e+00> : vector<8xf32>
    %137 = vector.multi_reduction <add>, %136, %cst_61 [1] : vector<8x128xf32> to vector<8xf32>
    %138 = vector.shape_cast %137 : vector<8xf32> to vector<8x1xf32>
    %139 = arith.mulf %135, %135 : vector<8x128xf32>
    %cst_62 = arith.constant dense<0.000000e+00> : vector<8xf32>
    %140 = vector.multi_reduction <add>, %139, %cst_62 [1] : vector<8x128xf32> to vector<8xf32>
    %141 = vector.shape_cast %140 : vector<8xf32> to vector<8x1xf32>
    %142 = arith.addf %138, %141 : vector<8x1xf32>
    %cst_63 = arith.constant 3.906250e-03 : f32
    %143 = vector.broadcast %cst_63 : f32 to vector<8x1xf32>
    %144 = arith.mulf %142, %143 : vector<8x1xf32>
    %cst_64 = arith.constant 9.99999974E-6 : f32
    %145 = vector.broadcast %cst_64 : f32 to vector<8x1xf32>
    %146 = arith.addf %144, %145 : vector<8x1xf32>
    %147 = math.rsqrt %146 : vector<8x1xf32>
    %148 = vector.broadcast %147 : vector<8x1xf32> to vector<8x128xf32>
    %149 = arith.mulf %133, %148 : vector<8x128xf32>
    %150 = arith.truncf %149 : vector<8x128xf32> to vector<8x128xbf16>
    %151 = vector.broadcast %147 : vector<8x1xf32> to vector<8x128xf32>
    %152 = arith.mulf %135, %151 : vector<8x128xf32>
    %153 = arith.truncf %152 : vector<8x128xf32> to vector<8x128xbf16>
    %c0_65 = arith.constant 0 : index
    %c0_66 = arith.constant 0 : index
    %154 = vector.load %arg2[%c0_65, %c0_66] : memref<128x256xbf16, #tpu.memory_space<vmem>>, vector<128x256xbf16>
    %cst_67 = arith.constant dense<0.000000e+00> : vector<8x256xf32>
    %155 = tpu.matmul %150, %154, %cst_67 {dimension_numbers = #tpu.dot_dimension_numbers<[1], [0], [0], [1], [0, 0, 1, 1], [], []>} : vector<8x128xbf16>, vector<128x256xbf16>, vector<8x256xf32> -> vector<8x256xf32>
    %c0_68 = arith.constant 0 : index
    %c0_69 = arith.constant 0 : index
    %156 = vector.load %arg3[%c0_68, %c0_69] : memref<128x256xbf16, #tpu.memory_space<vmem>>, vector<128x256xbf16>
    %cst_70 = arith.constant dense<0.000000e+00> : vector<8x256xf32>
    %157 = tpu.matmul %153, %156, %cst_70 {dimension_numbers = #tpu.dot_dimension_numbers<[1], [0], [0], [1], [0, 0, 1, 1], [], []>} : vector<8x128xbf16>, vector<128x256xbf16>, vector<8x256xf32> -> vector<8x256xf32>
    %158 = arith.addf %155, %157 : vector<8x256xf32>
    %c0_71 = arith.constant 0 : index
    %c0_72 = arith.constant 0 : index
    %159 = vector.load %arg4[%c0_71, %c0_72] : memref<1x256xf32, #tpu.memory_space<vmem>>, vector<1x256xf32>
    %160 = vector.broadcast %159 : vector<1x256xf32> to vector<8x256xf32>
    %161 = arith.addf %158, %160 : vector<8x256xf32>
    %162 = arith.truncf %161 : vector<8x256xf32> to vector<8x256xbf16>
    %c0_73 = arith.constant 0 : index
    %c768_74 = arith.constant 768 : index
    %163 = vector.load %arg5[%c0_73, %c768_74] : memref<8x1024xbf16, #tpu.memory_space<vmem>>, vector<8x256xbf16>
    tpu.vector_store %arg5[%c0_73, %c768_74], %162 {strides = array<i32>} : memref<8x1024xbf16, #tpu.memory_space<vmem>>, vector<8x256xbf16>,
    return
  }
  func.func @transform_0(%arg0: i32) -> (i32, i32) {
    %c0_i32 = arith.constant 0 : i32
    %c0_i32_0 = arith.constant 0 : i32
    return %arg0, %c0_i32 : i32, i32
  }
  func.func @transform_1(%arg0: i32) -> (i32, i32) {
    %c0_i32 = arith.constant 0 : i32
    %c0_i32_0 = arith.constant 0 : i32
    %c0_i32_1 = arith.constant 0 : i32
    return %c0_i32, %c0_i32_0 : i32, i32
  }
  func.func @transform_2(%arg0: i32) -> (i32, i32) {
    %c0_i32 = arith.constant 0 : i32
    %c0_i32_0 = arith.constant 0 : i32
    %c0_i32_1 = arith.constant 0 : i32
    return %c0_i32, %c0_i32_0 : i32, i32
  }
  func.func @transform_3(%arg0: i32) -> (i32, i32) {
    %c0_i32 = arith.constant 0 : i32
    %c0_i32_0 = arith.constant 0 : i32
    %c0_i32_1 = arith.constant 0 : i32
    return %c0_i32, %c0_i32_0 : i32, i32
  }
  func.func @transform_4(%arg0: i32) -> (i32, i32) {
    %c0_i32 = arith.constant 0 : i32
    %c0_i32_0 = arith.constant 0 : i32
    return %arg0, %c0_i32 : i32, i32
  }
}

</mosaic_0001>

<bundles_post_ra>
// kernel: patch_merging_pallas.1
= control target key start
LH: loop header
LB: loop body
LE: loop exit
PB: predicated region body
PF: predicated region fallthrough
CT: control target
= control target key end

     0   :  { %s1929_s0 = inlined_call_operand.vmem [shape: f32[8,1024], index: 0, kind: input, shape index: {}]   ;;  %s1930_s2 = inlined_call_operand.vmem [shape: bf16[128,256], index: 2, kind: input, shape index: {}]   ;;  %s1931_s1 = inlined_call_operand.vmem [shape: bf16[128,256], index: 1, kind: input, shape index: {}]   ;;  %s1932_s3 = inlined_call_operand.vmem [shape: f32[1,256], index: 3, kind: input, shape index: {}]   ;;  %s1933_s4 = inlined_call_operand.vmem [shape: bf16[8,1024], index: 4, kind: output, shape index: {}]  }
   0x1   :  { %v18_v0 = vld [vmem:[%s1929_s0] sm:$0xff]  ;;  %v339_v1 = vld [vmem:[%s1929_s0 + $0x8] sm:$0xff]  ;;  %v661_v4 = vld [vmem:[%s1929_s0 + $0x30] sm:$0xff] }
   0x2   :  { %20 = vadd.xlane.f32.xlu0 %v18_v0  ;;  %341 = vadd.xlane.f32.xlu1 %v339_v1  ;;  %v19_v2 = vld [vmem:[%s1929_s0 + $0x20] sm:$0xff]  ;;  %v340_v3 = vld [vmem:[%s1929_s0 + $0x28] sm:$0xff]  ;;  %v660_v5 = vld [vmem:[%s1929_s0 + $0x10] sm:$0xff] }
   0x3   :  { %v1546_v6 = vld [vmem:[%s1930_s2 + $0x4] ss:$8 sps:$4 sm:$0xff]   ;;  %v1557_v8 = vld [vmem:[%s1930_s2] ss:$8 sps:$4 sm:$0xff]   ;;  %v1568_v10 = vld [vmem:[%s1930_s2 + $0x14] ss:$8 sps:$4 sm:$0xff]  }
   0x4   :  { %v1551_v7 = vld [vmem:[%s1931_s1 + $0x4] ss:$8 sps:$4 sm:$0xff]   ;;  %154 = vmatprep.subr.bf16.mxu0 %v1546_v6  ;;  %v1562_v9 = vld [vmem:[%s1931_s1] ss:$8 sps:$4 sm:$0xff]   ;;  %v1575_v11 = vld [vmem:[%s1931_s1 + $0x14] ss:$8 sps:$4 sm:$0xff]  }
   0x5   :  { %275 = vmatprep.subr.bf16.mxu1 %v1551_v7  ;;  %155 = vmatpush1.bf16.msra.mxu0 %v1557_v8  ;;  %v1580_v12 = vld [vmem:[%s1930_s2 + $0x10] ss:$8 sps:$4 sm:$0xff]   ;;  %v1592_v14 = vld [vmem:[%s1930_s2 + $0x24] ss:$8 sps:$4 sm:$0xff]   ;;  %v1602_v16 = vld [vmem:[%s1930_s2 + $0x20] ss:$8 sps:$4 sm:$0xff]  }
   0x6   :  { %22 = vadd.xlane.f32.xlu0 %v19_v2  ;;  %343 = vadd.xlane.f32.xlu1 %v340_v3  ;;  %v1586_v13 = vld [vmem:[%s1931_s1 + $0x10] ss:$8 sps:$4 sm:$0xff]   ;;  %v1597_v15 = vld [vmem:[%s1931_s1 + $0x24] ss:$8 sps:$4 sm:$0xff]   ;;  %v1607_v17 = vld [vmem:[%s1931_s1 + $0x20] ss:$8 sps:$4 sm:$0xff]  }
   0x7   :  { %276 = vmatpush1.bf16.msra.mxu1 %v1562_v9  ;;  %156 = vmatprep.subr.bf16.mxu0 %v1568_v10  ;;  %v1630_v36 = vld [vmem:[%s1929_s0 + $0x38] sm:$0xff]  ;;  %v1678_v48 = vld [vmem:[%s1930_s2 + $0x44] ss:$8 sps:$4 sm:$0xff]   ;;  %v1688_v50 = vld [vmem:[%s1930_s2 + $0x40] ss:$8 sps:$4 sm:$0xff]  }
   0x8   :  { %277 = vmatprep.subr.bf16.mxu1 %v1575_v11  ;;  %v1635_v37 = vld [vmem:[%s1929_s0 + $0x18] sm:$0xff]  ;;  %v1683_v49 = vld [vmem:[%s1931_s1 + $0x44] ss:$8 sps:$4 sm:$0xff]   ;;  %v1693_v51 = vld [vmem:[%s1931_s1 + $0x40] ss:$8 sps:$4 sm:$0xff]  }
   0x9   :  { %157 = vmatpush1.bf16.msra.mxu0 %v1580_v12  ;;  %v1654_v44 = vld [vmem:[%s1930_s2 + $0x34] ss:$8 sps:$4 sm:$0xff]   ;;  %v1664_v46 = vld [vmem:[%s1930_s2 + $0x30] ss:$8 sps:$4 sm:$0xff]   ;;  %v1726_v56 = vld [vmem:[%s1930_s2 + $0x64] ss:$8 sps:$4 sm:$0xff]  }
   0xa   :  { %664 = vadd.xlane.f32.xlu1 %v661_v4  ;;  %662 = vadd.xlane.f32.xlu0 %v660_v5  ;;  %v1659_v45 = vld [vmem:[%s1931_s1 + $0x34] ss:$8 sps:$4 sm:$0xff]   ;;  %v1669_v47 = vld [vmem:[%s1931_s1 + $0x30] ss:$8 sps:$4 sm:$0xff]   ;;  %v1731_v57 = vld [vmem:[%s1931_s1 + $0x64] ss:$8 sps:$4 sm:$0xff]  }
   0xb   :  { %278 = vmatpush1.bf16.msra.mxu1 %v1586_v13  ;;  %158 = vmatprep.subr.bf16.mxu0 %v1592_v14  ;;  %v1702_v52 = vld [vmem:[%s1930_s2 + $0x54] ss:$8 sps:$4 sm:$0xff]   ;;  %v1712_v54 = vld [vmem:[%s1930_s2 + $0x50] ss:$8 sps:$4 sm:$0xff]   ;;  %v1736_v58 = vld [vmem:[%s1930_s2 + $0x60] ss:$8 sps:$4 sm:$0xff]  }
   0xc   :  { %279 = vmatprep.subr.bf16.mxu1 %v1597_v15  ;;  %v1707_v53 = vld [vmem:[%s1931_s1 + $0x54] ss:$8 sps:$4 sm:$0xff]   ;;  %v1717_v55 = vld [vmem:[%s1931_s1 + $0x50] ss:$8 sps:$4 sm:$0xff]   ;;  %v1741_v59 = vld [vmem:[%s1931_s1 + $0x60] ss:$8 sps:$4 sm:$0xff]  }
   0xd   :  { %159 = vmatpush1.bf16.msra.mxu0 %v1602_v16  ;;  %v1750_v60 = vld [vmem:[%s1930_s2 + $0x74] ss:$8 sps:$4 sm:$0xff]   ;;  %v1760_v62 = vld [vmem:[%s1930_s2 + $0x70] ss:$8 sps:$4 sm:$0xff]  }
   0xe   :  { %160 = vmatprep.subr.bf16.mxu0 %v1654_v44  ;;  %v1755_v61 = vld [vmem:[%s1931_s1 + $0x74] ss:$8 sps:$4 sm:$0xff]   ;;  %v1765_v63 = vld [vmem:[%s1931_s1 + $0x70] ss:$8 sps:$4 sm:$0xff]  }
   0xf   :  { %280 = vmatpush1.bf16.msra.mxu1 %v1607_v17 }
  0x10   :  { %281 = vmatprep.subr.bf16.mxu1 %v1659_v45 }
  0x11   :  { %161 = vmatpush1.bf16.msra.mxu0 %v1664_v46 }
  0x12   :  { %162 = vmatprep.subr.bf16.mxu0 %v1678_v48 }
  0x13   :  { %282 = vmatpush1.bf16.msra.mxu1 %v1669_v47 }
  0x14   :  { %283 = vmatprep.subr.bf16.mxu1 %v1683_v49 }
  0x15   :  { %163 = vmatpush1.bf16.msra.mxu0 %v1688_v50 }
  0x16   :  { %164 = vmatprep.subr.bf16.mxu0 %v1702_v52 }
  0x17   :  { %284 = vmatpush1.bf16.msra.mxu1 %v1693_v51 }
  0x18   :  { %285 = vmatprep.subr.bf16.mxu1 %v1707_v53 }
  0x19   :  { %165 = vmatpush1.bf16.msra.mxu0 %v1712_v54 }
  0x1a   :  { %166 = vmatprep.subr.bf16.mxu0 %v1726_v56 }
  0x1b   :  { %286 = vmatpush1.bf16.msra.mxu1 %v1717_v55 }
  0x1c   :  { %287 = vmatprep.subr.bf16.mxu1 %v1731_v57 }
  0x1d   :  { %167 = vmatpush1.bf16.msra.mxu0 %v1736_v58 }
  0x1e   :  { %168 = vmatprep.subr.bf16.mxu0 %v1750_v60 }
  0x1f   :  { %288 = vmatpush1.bf16.msra.mxu1 %v1741_v59 }
  0x20   :  { %289 = vmatprep.subr.bf16.mxu1 %v1755_v61 }
  0x21   :  { %169 = vmatpush1.bf16.msra.mxu0 %v1760_v62 }
  0x22   :  { %475 = vmatprep.subr.bf16.mxu0 %v1546_v6 }
  0x23   :  { %290 = vmatpush1.bf16.msra.mxu1 %v1765_v63 }
  0x24   :  { %596 = vmatprep.subr.bf16.mxu1 %v1551_v7 }
  0x8f   :  { %v21_v18 = vpop.xlane.xlu0 %20  ;;  %v342_v19 = vpop.xlane.xlu1 %341 }
  0x93   :  { %v23_v20 = vpop.xlane.xlu0 %22  ;;  %v344_v21 = vpop.xlane.xlu1 %343 }
  0x94   :  { %v24_v22 = vadd.f32 %v23_v20, %v21_v18  ;;  %v345_v23 = vadd.f32 %v344_v21, %v342_v19 }
  0x96   :  { %v25_v24 = vmul.f32 0.00390625, %v24_v22  ;;  %v346_v25 = vmul.f32 0.00390625, %v345_v23 }
  0x97   :  { %v665_v26 = vpop.xlane.xlu1 %664  ;;  %v663_v27 = vpop.xlane.xlu0 %662 }
  0x98   :  { %v1615_v28 = vsub.f32 %v18_v0, %v25_v24  ;;  %v1617_v29 = vsub.f32 %v19_v2, %v25_v24  ;;  %v666_v30 = vadd.f32 %v665_v26, %v663_v27  ;;  %v1623_v33 = vsub.f32 %v340_v3, %v346_v25 }
  0x99   :  { %v1625_v34 = vsub.f32 %v339_v1, %v346_v25  ;;  %v1499_v0 = vmov 0  }
  0x9a   :  { %v31_v31 = vmul.f32 %v1617_v29, %v1617_v29  ;;  %v28_v32 = vmul.f32 %v1615_v28, %v1615_v28  ;;  %v667_v35 = vmul.f32 0.00390625, %v666_v30  ;;  %v352_v38 = vmul.f32 %v1623_v33, %v1623_v33  ;;  %186 = vmatprep.mubr.bf16.mxu0 %v1499_v0  ;;  %307 = vmatprep.mubr.bf16.mxu1 %v1499_v0 }
  0x9b   :  { %v349_v41 = vmul.f32 %v1625_v34, %v1625_v34 }
  0x9c   :  { %32 = vadd.xlane.f32.xlu1 %v31_v31  ;;  %29 = vadd.xlane.f32.xlu0 %v28_v32  ;;  %v1639_v39 = vsub.f32 %v660_v5, %v667_v35  ;;  %v1641_v40 = vsub.f32 %v661_v4, %v667_v35 }
  0x9e   :  { %v673_v42 = vmul.f32 %v1641_v40, %v1641_v40  ;;  %v670_v43 = vmul.f32 %v1639_v39, %v1639_v39 }
  0xa0   :  { %985 = vadd.xlane.f32.xlu1 %v1630_v36  ;;  %983 = vadd.xlane.f32.xlu0 %v1635_v37 }
  0xa4   :  { %353 = vadd.xlane.f32.xlu1 %v352_v38  ;;  %350 = vadd.xlane.f32.xlu0 %v349_v41 }
  0xa8   :  { %674 = vadd.xlane.f32.xlu1 %v673_v42  ;;  %671 = vadd.xlane.f32.xlu0 %v670_v43 }
 0x129   :  { %v33_v1 = vpop.xlane.xlu1 %32  ;;  %v30_v2 = vpop.xlane.xlu0 %29 }
 0x12a   :  { %v34_v3 = vadd.f32 %v33_v1, %v30_v2 }
 0x12c   :  { %v35_v4 = vmul.f32 0.00390625, %v34_v3 }
 0x12d   :  { %v986_v5 = vpop.xlane.xlu1 %985  ;;  %v984_v18 = vpop.xlane.xlu0 %983 }
 0x12e   :  { %v36_v19 = vadd.f32 1e-05, %v35_v4  ;;  %v987_v20 = vadd.f32 %v986_v5, %v984_v18 }
 0x130   :  { %1491 = vrsqrt.f32 %v36_v19  ;;  %v988_v21 = vmul.f32 0.00390625, %v987_v20 }
 0x131   :  { %v354_v31 = vpop.xlane.xlu1 %353  ;;  %v351_v32 = vpop.xlane.xlu0 %350 }
 0x132   :  { %v1776_v22 = vsub.f32 %v1635_v37, %v988_v21  ;;  %v1779_v23 = vsub.f32 %v1630_v36, %v988_v21  ;;  %v355_v36 = vadd.f32 %v354_v31, %v351_v32 }
 0x134   :  { %v994_v24 = vmul.f32 %v1779_v23, %v1779_v23  ;;  %v991_v25 = vmul.f32 %v1776_v22, %v1776_v22 }
 0x135   :  { %v675_v43 = vpop.xlane.xlu1 %674  ;;  %v672_v1 = vpop.xlane.xlu0 %671 }
 0x136   :  { %995 = vadd.xlane.f32.xlu1 %v994_v24  ;;  %992 = vadd.xlane.f32.xlu0 %v991_v25  ;;  %v676_v4 = vadd.f32 %v675_v43, %v672_v1 }
 0x13a   :  { %v1492_v26 = vpop.eup %1491 }
 0x13b   :  { %v40_v27 = vmul.f32 %v1492_v26, %v1617_v29  ;;  %v38_v30 = vmul.f32 %v1492_v26, %v1615_v28  ;;  %v356_v28 = vmul.f32 0.00390625, %v355_v36  ;;  %v958_v36 = vld [vmem:[%s1932_s3] sm:$0x3] }
 0x13d   :  { %v41_v35 = vpack.c.bf16 %v40_v27, %v40_v27  ;;  %v39_v37 = vpack.c.bf16 %v38_v30, %v38_v30  ;;  %v357_v29 = vadd.f32 1e-05, %v356_v28 }
 0x13f   :  { %187 = vmatmul.mubr.bf16.vlgmr.msra.gmra.mrb[0].mxu0 %v41_v35  ;;  %308 = vmatmul.mubr.bf16.vlgmr.msra.gmra.mrb[0].mxu1 %v39_v37  ;;  %1493 = vrsqrt.f32 %v357_v29 }
 0x140   :  { %476 = vmatpush1.bf16.msra.mxu0 %v1557_v8  ;;  %597 = vmatpush1.bf16.msra.mxu1 %v1562_v9 }
 0x141   :  { %477 = vmatprep.subr.bf16.mxu0 %v1568_v10  ;;  %598 = vmatprep.subr.bf16.mxu1 %v1575_v11 }
 0x142   :  { %507 = vmatprep.mubr.bf16.mxu0 %v1499_v0  ;;  %628 = vmatprep.mubr.bf16.mxu1 %v1499_v0 }
 0x144   :  { %478 = vmatpush1.bf16.msra.mxu0 %v1580_v12  ;;  %599 = vmatpush1.bf16.msra.mxu1 %v1586_v13 }
 0x145   :  { %479 = vmatprep.subr.bf16.mxu0 %v1592_v14  ;;  %600 = vmatprep.subr.bf16.mxu1 %v1597_v15 }
 0x148   :  { %480 = vmatpush1.bf16.msra.mxu0 %v1602_v16  ;;  %601 = vmatpush1.bf16.msra.mxu1 %v1607_v17 }
 0x149   :  { %481 = vmatprep.subr.bf16.mxu0 %v1654_v44  ;;  %602 = vmatprep.subr.bf16.mxu1 %v1659_v45  ;;  %v1494_v38 = vpop.eup %1493 }
 0x14a   :  { %v361_v41 = vmul.f32 %v1494_v38, %v1623_v33  ;;  %v359_v42 = vmul.f32 %v1494_v38, %v1625_v34  ;;  %v677_v33 = vmul.f32 0.00390625, %v676_v4 }
 0x14c   :  { %482 = vmatpush1.bf16.msra.mxu0 %v1664_v46  ;;  %603 = vmatpush1.bf16.msra.mxu1 %v1669_v47  ;;  %v362_v2 = vpack.c.bf16 %v361_v41, %v361_v41  ;;  %v360_v3 = vpack.c.bf16 %v359_v42, %v359_v42  ;;  %v678_v34 = vadd.f32 1e-05, %v677_v33 }
 0x14d   :  { %483 = vmatprep.subr.bf16.mxu0 %v1678_v48  ;;  %604 = vmatprep.subr.bf16.mxu1 %v1683_v49 }
 0x14e   :  { %1495 = vrsqrt.f32 %v678_v34 }
 0x150   :  { %484 = vmatpush1.bf16.msra.mxu0 %v1688_v50  ;;  %605 = vmatpush1.bf16.msra.mxu1 %v1693_v51 }
 0x151   :  { %485 = vmatprep.subr.bf16.mxu0 %v1702_v52  ;;  %606 = vmatprep.subr.bf16.mxu1 %v1707_v53 }
 0x154   :  { %486 = vmatpush1.bf16.msra.mxu0 %v1712_v54  ;;  %607 = vmatpush1.bf16.msra.mxu1 %v1717_v55 }
 0x155   :  { %487 = vmatprep.subr.bf16.mxu0 %v1726_v56  ;;  %608 = vmatprep.subr.bf16.mxu1 %v1731_v57 }
 0x158   :  { %488 = vmatpush1.bf16.msra.mxu0 %v1736_v58  ;;  %609 = vmatpush1.bf16.msra.mxu1 %v1741_v59  ;;  %v1496_v5 = vpop.eup %1495 }
 0x159   :  { %489 = vmatprep.subr.bf16.mxu0 %v1750_v60  ;;  %610 = vmatprep.subr.bf16.mxu1 %v1755_v61  ;;  %v682_v18 = vmul.f32 %v1496_v5, %v1641_v40  ;;  %v680_v19 = vmul.f32 %v1496_v5, %v1639_v39  ;;  %v316_v40 = vld [vmem:[%s1932_s3] sm:$0x3] }
 0x15b   :  { %v683_v20 = vpack.c.bf16 %v682_v18, %v682_v18  ;;  %v681_v21 = vpack.c.bf16 %v680_v19, %v680_v19 }
 0x15c   :  { %490 = vmatpush1.bf16.msra.mxu0 %v1760_v62  ;;  %611 = vmatpush1.bf16.msra.mxu1 %v1765_v63 }
 0x15d   :  { %796 = vmatprep.subr.bf16.mxu0 %v1546_v6  ;;  %917 = vmatprep.subr.bf16.mxu1 %v1551_v7 }
 0x15f   :  { %508 = vmatmul.mubr.bf16.vlgmr.msra.gmra.mrb[4].mxu0 %v362_v2  ;;  %629 = vmatmul.mubr.bf16.vlgmr.msra.gmra.mrb[4].mxu1 %v360_v3 }
 0x160   :  { %797 = vmatpush1.bf16.msra.mxu0 %v1557_v8  ;;  %918 = vmatpush1.bf16.msra.mxu1 %v1562_v9 }
 0x161   :  { %798 = vmatprep.subr.bf16.mxu0 %v1568_v10  ;;  %919 = vmatprep.subr.bf16.mxu1 %v1575_v11 }
 0x162   :  { %828 = vmatprep.mubr.bf16.mxu0 %v1499_v0  ;;  %949 = vmatprep.mubr.bf16.mxu1 %v1499_v0 }
 0x164   :  { %799 = vmatpush1.bf16.msra.mxu0 %v1580_v12  ;;  %920 = vmatpush1.bf16.msra.mxu1 %v1586_v13 }
 0x165   :  { %800 = vmatprep.subr.bf16.mxu0 %v1592_v14  ;;  %921 = vmatprep.subr.bf16.mxu1 %v1597_v15 }
 0x168   :  { %801 = vmatpush1.bf16.msra.mxu0 %v1602_v16  ;;  %922 = vmatpush1.bf16.msra.mxu1 %v1607_v17 }
 0x169   :  { %802 = vmatprep.subr.bf16.mxu0 %v1654_v44  ;;  %923 = vmatprep.subr.bf16.mxu1 %v1659_v45 }
 0x16c   :  { %803 = vmatpush1.bf16.msra.mxu0 %v1664_v46  ;;  %924 = vmatpush1.bf16.msra.mxu1 %v1669_v47 }
 0x16d   :  { %804 = vmatprep.subr.bf16.mxu0 %v1678_v48  ;;  %925 = vmatprep.subr.bf16.mxu1 %v1683_v49 }
 0x170   :  { %805 = vmatpush1.bf16.msra.mxu0 %v1688_v50  ;;  %926 = vmatpush1.bf16.msra.mxu1 %v1693_v51 }
 0x171   :  { %806 = vmatprep.subr.bf16.mxu0 %v1702_v52  ;;  %927 = vmatprep.subr.bf16.mxu1 %v1707_v53 }
 0x174   :  { %807 = vmatpush1.bf16.msra.mxu0 %v1712_v54  ;;  %928 = vmatpush1.bf16.msra.mxu1 %v1717_v55 }
 0x175   :  { %808 = vmatprep.subr.bf16.mxu0 %v1726_v56  ;;  %929 = vmatprep.subr.bf16.mxu1 %v1731_v57 }
 0x178   :  { %809 = vmatpush1.bf16.msra.mxu0 %v1736_v58  ;;  %930 = vmatpush1.bf16.msra.mxu1 %v1741_v59 }
 0x179   :  { %810 = vmatprep.subr.bf16.mxu0 %v1750_v60  ;;  %931 = vmatprep.subr.bf16.mxu1 %v1755_v61 }
 0x17c   :  { %811 = vmatpush1.bf16.msra.mxu0 %v1760_v62  ;;  %932 = vmatpush1.bf16.msra.mxu1 %v1765_v63 }
 0x17d   :  { %1117 = vmatprep.subr.bf16.mxu0 %v1546_v6  ;;  %1238 = vmatprep.subr.bf16.mxu1 %v1551_v7 }
 0x17f   :  { %829 = vmatmul.mubr.bf16.vlgmr.msra.gmra.mrb[8].mxu0 %v683_v20  ;;  %950 = vmatmul.mubr.bf16.vlgmr.msra.gmra.mrb[8].mxu1 %v681_v21  ;;  %v1279_v20 = vld [vmem:[%s1932_s3] sm:$0x3] }
 0x180   :  { %1118 = vmatpush1.bf16.msra.mxu0 %v1557_v8  ;;  %1239 = vmatpush1.bf16.msra.mxu1 %v1562_v9 }
 0x181   :  { %1119 = vmatprep.subr.bf16.mxu0 %v1568_v10  ;;  %1240 = vmatprep.subr.bf16.mxu1 %v1575_v11 }
 0x182   :  { %1149 = vmatprep.mubr.bf16.mxu0 %v1499_v0  ;;  %1270 = vmatprep.mubr.bf16.mxu1 %v1499_v0 }
 0x184   :  { %1120 = vmatpush1.bf16.msra.mxu0 %v1580_v12  ;;  %1241 = vmatpush1.bf16.msra.mxu1 %v1586_v13 }
 0x185   :  { %1121 = vmatprep.subr.bf16.mxu0 %v1592_v14  ;;  %1242 = vmatprep.subr.bf16.mxu1 %v1597_v15 }
 0x188   :  { %1122 = vmatpush1.bf16.msra.mxu0 %v1602_v16  ;;  %1243 = vmatpush1.bf16.msra.mxu1 %v1607_v17  ;;  %v318_v16 = vlaneseq }
 0x189   :  { %1123 = vmatprep.subr.bf16.mxu0 %v1654_v44  ;;  %1244 = vmatprep.subr.bf16.mxu1 %v1659_v45 }
 0x18a   :  { %v319_v17 = vshrl.u32 %v318_v16, 7 }
 0x18c   :  { %1124 = vmatpush1.bf16.msra.mxu0 %v1664_v46  ;;  %1245 = vmatpush1.bf16.msra.mxu1 %v1669_v47  ;;  %v1893_v39 = vsub.s32 0, %v319_v17  ;;  %v1898_v44 = vsub.s32 1, %v319_v17 }
 0x18d   :  { %1125 = vmatprep.subr.bf16.mxu0 %v1678_v48  ;;  %1246 = vmatprep.subr.bf16.mxu1 %v1683_v49 }
 0x18e   :  { %v321_v45 = vrot.slane %v316_v40, %v1893_v39  ;;  %v325_v48 = vrot.slane %v316_v40, %v1898_v44  ;;  %v963_v28 = vrot.slane %v958_v36, %v1893_v39  ;;  %v967_v41 = vrot.slane %v958_v36, %v1898_v44 }
 0x18f   :  { %v1284_v21 = vrot.slane %v1279_v20, %v1893_v39 }
 0x190   :  { %1126 = vmatpush1.bf16.msra.mxu0 %v1688_v50  ;;  %1247 = vmatpush1.bf16.msra.mxu1 %v1693_v51 }
 0x191   :  { %1127 = vmatprep.subr.bf16.mxu0 %v1702_v52  ;;  %1248 = vmatprep.subr.bf16.mxu1 %v1707_v53 }
 0x194   :  { %1128 = vmatpush1.bf16.msra.mxu0 %v1712_v54  ;;  %1249 = vmatpush1.bf16.msra.mxu1 %v1717_v55 }
 0x195   :  { %1129 = vmatprep.subr.bf16.mxu0 %v1726_v56  ;;  %1250 = vmatprep.subr.bf16.mxu1 %v1731_v57 }
 0x198   :  { %1130 = vmatpush1.bf16.msra.mxu0 %v1736_v58  ;;  %1251 = vmatpush1.bf16.msra.mxu1 %v1741_v59 }
 0x199   :  { %1131 = vmatprep.subr.bf16.mxu0 %v1750_v60  ;;  %1252 = vmatprep.subr.bf16.mxu1 %v1755_v61  ;;  %v637_v60 = vld [vmem:[%s1932_s3] sm:$0x3] }
 0x19a   :  { %v642_v61 = vrot.slane %v637_v60, %v1893_v39  ;;  %v646_v0 = vrot.slane %v637_v60, %v1898_v44 }
 0x19c   :  { %1132 = vmatpush1.bf16.msra.mxu0 %v1760_v62  ;;  %1253 = vmatpush1.bf16.msra.mxu1 %v1765_v63 }
 0x1c3   :  { %v996_v6 = vpop.xlane.xlu1 %995  ;;  %v993_v7 = vpop.xlane.xlu0 %992 }
 0x1c4   :  { %v997_v8 = vadd.f32 %v996_v6, %v993_v7 }
 0x1c6   :  { %v998_v9 = vmul.f32 0.00390625, %v997_v8  ;;  %v1288_v8 = vrot.slane %v1279_v20, %v1898_v44 }
 0x1c8   :  { %v999_v10 = vadd.f32 1e-05, %v998_v9 }
 0x1ca   :  { %1497 = vrsqrt.f32 %v999_v10 }
 0x1d4   :  { %v1498_v11 = vpop.eup %1497 }
 0x1d5   :  { %v1003_v12 = vmul.f32 %v1498_v11, %v1779_v23  ;;  %v1001_v13 = vmul.f32 %v1498_v11, %v1776_v22 }
 0x1d7   :  { %v1004_v14 = vpack.c.bf16 %v1003_v12, %v1003_v12  ;;  %v1002_v15 = vpack.c.bf16 %v1001_v13, %v1001_v13 }
 0x1d9   :  { %1150 = vmatmul.mubr.bf16.vlgmr.msra.gmra.mrb[12].mxu0 %v1004_v14  ;;  %1271 = vmatmul.mubr.bf16.vlgmr.msra.gmra.mrb[12].mxu1 %v1002_v15 }
 0x212   :  { %v188_v46 = vpop.f32.mrb[0].mxu0  ;;  %v309_v47 = vpop.f32.mrb[0].mxu1 }
 0x213   :  { %v310_v49 = vadd.f32 %v309_v47, %v188_v46  ;;  %v190_v50 = vpop.f32.mrb[1].mxu0  ;;  %v311_v51 = vpop.f32.mrb[1].mxu1 }
 0x214   :  { %v312_v52 = vadd.f32 %v311_v51, %v190_v50  ;;  %v192_v53 = vpop.f32.mrb[2].mxu0  ;;  %v313_v54 = vpop.f32.mrb[2].mxu1 }
 0x215   :  { %v328_v55 = vadd.f32 %v321_v45, %v310_v49  ;;  %v193_v56 = vpop.f32.mrb[3].mxu0  ;;  %v314_v57 = vpop.f32.mrb[3].mxu1 }
 0x216   :  { %v329_v58 = vadd.f32 %v325_v48, %v312_v52 }
 0x218   :  { %v1438_v59 = vpack.c.bf16 %v329_v58, %v328_v55 }
 0x21a   :  { %338 = vst [vmem:[%s1933_s4] sm:$0xff] %v1438_v59 }
 0x232   :  { %v509_v62 = vpop.f32.mrb[4].mxu0  ;;  %v630_v63 = vpop.f32.mrb[4].mxu1 }
 0x233   :  { %v631_v22 = vadd.f32 %v630_v63, %v509_v62  ;;  %v511_v23 = vpop.f32.mrb[5].mxu0  ;;  %v632_v24 = vpop.f32.mrb[5].mxu1 }
 0x234   :  { %v633_v25 = vadd.f32 %v632_v24, %v511_v23  ;;  %v513_v26 = vpop.f32.mrb[6].mxu0  ;;  %v634_v27 = vpop.f32.mrb[6].mxu1 }
 0x235   :  { %v649_v30 = vadd.f32 %v642_v61, %v631_v22  ;;  %v514_v31 = vpop.f32.mrb[7].mxu0  ;;  %v635_v32 = vpop.f32.mrb[7].mxu1 }
 0x236   :  { %v650_v35 = vadd.f32 %v646_v0, %v633_v25 }
 0x238   :  { %v1439_v37 = vpack.c.bf16 %v650_v35, %v649_v30 }
 0x23a   :  { %659 = vst [vmem:[%s1933_s4 + $0x8] sm:$0xff] %v1439_v37 }
 0x252   :  { %v830_v29 = vpop.f32.mrb[8].mxu0  ;;  %v951_v38 = vpop.f32.mrb[8].mxu1 }
 0x253   :  { %v952_v42 = vadd.f32 %v951_v38, %v830_v29  ;;  %v832_v43 = vpop.f32.mrb[9].mxu0  ;;  %v953_v1 = vpop.f32.mrb[9].mxu1 }
 0x254   :  { %v954_v2 = vadd.f32 %v953_v1, %v832_v43  ;;  %v834_v3 = vpop.f32.mrb[10].mxu0  ;;  %v955_v4 = vpop.f32.mrb[10].mxu1 }
 0x255   :  { %v970_v33 = vadd.f32 %v963_v28, %v952_v42  ;;  %v835_v34 = vpop.f32.mrb[11].mxu0  ;;  %v956_v5 = vpop.f32.mrb[11].mxu1 }
 0x256   :  { %v971_v18 = vadd.f32 %v967_v41, %v954_v2 }
 0x258   :  { %v1440_v19 = vpack.c.bf16 %v971_v18, %v970_v33 }
 0x25a   :  { %980 = vst [vmem:[%s1933_s4 + $0x10] sm:$0xff] %v1440_v19 }
 0x2ac   :  { %v1151_v6 = vpop.f32.mrb[12].mxu0  ;;  %v1272_v7 = vpop.f32.mrb[12].mxu1 }
 0x2ad   :  { %v1273_v9 = vadd.f32 %v1272_v7, %v1151_v6  ;;  %v1153_v10 = vpop.f32.mrb[13].mxu0  ;;  %v1274_v11 = vpop.f32.mrb[13].mxu1 }
 0x2ae   :  { %v1275_v12 = vadd.f32 %v1274_v11, %v1153_v10  ;;  %v1155_v13 = vpop.f32.mrb[14].mxu0  ;;  %v1276_v14 = vpop.f32.mrb[14].mxu1 }
 0x2af   :  { %v1291_v15 = vadd.f32 %v1284_v21, %v1273_v9  ;;  %v1156_v16 = vpop.f32.mrb[15].mxu0  ;;  %v1277_v17 = vpop.f32.mrb[15].mxu1 }
 0x2b0   :  { %v1292_v40 = vadd.f32 %v1288_v8, %v1275_v12 }
 0x2b2   :  { %v1441_v45 = vpack.c.bf16 %v1292_v40, %v1291_v15 }
 0x2b4   :  { %1301 = vst [vmem:[%s1933_s4 + $0x18] sm:$0xff] %v1441_v45 }

</bundles_post_ra>
